<compile_context>
chip_gen: v7x
topology: tpu7x:2x2x1
jax: 0.10.0
libtpu: 0.0.40
codegen_flags: <defaults>
</compile_context>

<pallas_src>
import functools

import jax
import jax.numpy as jnp
import numpy as np
from jax import lax
from jax.experimental import pallas as pl
from jax.experimental.pallas import tpu as pltpu  # noqa: F401  (kept for TPU-specific tuning hooks)

EPS = 1e-12
POWER_ITERATIONS = 2


def _round_up(x, m):
    return ((x + m - 1) // m) * m


# ----------------------------------------------------------------------------
# Fused kernel: power iteration + sigma + conv-as-shifted-tap-matmuls + bias.
#
#   w_mat_ref : (Cout, K)         flattened weight (K = Cin*KH*KW)
#   w_taps_ref: (KH*KW, Cout, Cin) same weight, tap-major (for the conv)
#   u_ref     : (1, Cout)
#   v_ref     : (1, K)
#   bias_ref  : (Cout, 1)
#   xf_ref    : (Cin, Lpad)       zero-padded image, flattened (b, hp, wp) then lane-padded
#   out_ref   : (Cout, Mker)      lane-dense transposed conv output (Mker multiple of 128)
# ----------------------------------------------------------------------------
def _fused_spectral_conv_kernel(
    w_mat_ref, w_taps_ref, u_ref, v_ref, bias_ref, xf_ref,
    out_ref, u_out_ref, v_out_ref,
    *, kh, kw, wp, n_iter,
):
    # ---- spectral norm: power iteration + sigma (everything stays in VMEM) ----
    w = w_mat_ref[...]          # (Cout, K)
    u = u_ref[...]              # (1, Cout)
    v = v_ref[...]              # (1, K)
    for _ in range(n_iter):
        # v <- l2normalize(W^T u)   (row-vector form: u @ W)
        v_new = jnp.dot(u, w, preferred_element_type=jnp.float32)            # (1, K)
        v = v_new * (1.0 / (jnp.sqrt(jnp.sum(v_new * v_new)) + EPS))
        # u <- l2normalize(W v): contract v with w along K, no explicit w.T.
        u_new = lax.dot_general(v, w, (((1,), (1,)), ((), ())),
                                preferred_element_type=jnp.float32)          # (1, Cout)
        u = u_new * (1.0 / (jnp.sqrt(jnp.sum(u_new * u_new)) + EPS))
    sigma = jnp.sum(jnp.dot(u, w, preferred_element_type=jnp.float32) * v)
    inv_sigma = 1.0 / sigma     # scalar reciprocal; scales the conv output instead of W.

    # ---- conv: 9 kernel taps == 9 static lane-offset slices of the flat padded image ----
    xf = xf_ref[...]                                   # (Cin, Lpad)
    mker = out_ref.shape[1]
    acc = jnp.zeros(out_ref.shape, jnp.float32)        # (Cout, Mker), lane-dense accumulator
    for t in range(kh * kw):
        i, j = t // kw, t % kw
        s = i * wp + j                                 # static flat offset of tap (i, j)
        acc = acc + jnp.dot(w_taps_ref[t], xf[:, s:s + mker],
                            preferred_element_type=jnp.float32)

    out_ref[...] = (acc * inv_sigma + bias_ref[...]).astype(out_ref.dtype)
    u_out_ref[...] = u.astype(u_out_ref.dtype)
    v_out_ref[...] = v.astype(v_out_ref.dtype)


# ----------------------------------------------------------------------------
# Wrapper: layout plumbing only (pad / transpose / reshape of tiny tensors),
# then one pallas_call.
# ----------------------------------------------------------------------------
def spectral_norm_conv_forward(x, weight, bias, u, v):
    """Forward of SpectralNorm(Conv2d(pad=1, stride=1)): update u/v, conv with W/sigma."""
    cout, cin, kh, kw = weight.shape
    b, _, h, w = x.shape
    hp, wp = h + 2, w + 2                      # zero-padded spatial dims (pad=1)
    n_pix = hp * wp                            # flat pixels per (batch, channel)
    k = cin * kh * kw
    m_valid = b * n_pix                        # flat length actually produced
    mker = _round_up(m_valid, 128)             # lane-dense output width (multiple of 128)
    max_s = (kh - 1) * wp + (kw - 1)           # largest tap offset
    lpad = _round_up(max_s + mker, 128)        # input lane padding so all tap slices fit

    # Weight in both layouts (1.2 KB each — free): flat for power iteration, tap-major for conv.
    w_mat = weight.reshape(cout, k)
    w_taps = weight.transpose(2, 3, 0, 1).reshape(kh * kw, cout, cin)

    # Pad once, flatten (Cin, B*Hp*Wp), lane-pad.  No 9x im2col expansion through HBM.
    xp = jnp.pad(x, ((0, 0), (0, 0), (1, 1), (1, 1)))
    xf = xp.transpose(1, 0, 2, 3).reshape(cin, m_valid)
    xf = jnp.pad(xf, ((0, 0), (0, lpad - m_valid)))

    kernel = functools.partial(
        _fused_spectral_conv_kernel, kh=kh, kw=kw, wp=wp, n_iter=POWER_ITERATIONS)

    out_pad, u_new, v_new = pl.pallas_call(
        kernel,
        out_shape=(
            jax.ShapeDtypeStruct((cout, mker), x.dtype),
            jax.ShapeDtypeStruct((1, cout), w_mat.dtype),
            jax.ShapeDtypeStruct((1, k), w_mat.dtype),
        ),
        in_specs=[
            pl.BlockSpec((cout, k), lambda: (0, 0)),
            pl.BlockSpec((kh * kw, cout, cin), lambda: (0, 0, 0)),
            pl.BlockSpec((1, cout), lambda: (0, 0)),
            pl.BlockSpec((1, k), lambda: (0, 0)),
            pl.BlockSpec((cout, 1), lambda: (0, 0)),
            pl.BlockSpec((cin, lpad), lambda: (0, 0)),
        ],
        out_specs=(
            pl.BlockSpec((cout, mker), lambda: (0, 0)),
            pl.BlockSpec((1, cout), lambda: (0, 0)),
            pl.BlockSpec((1, k), lambda: (0, 0)),
        ),
    )(w_mat, w_taps, u.reshape(1, cout), v.reshape(1, k), bias.reshape(cout, 1), xf)

    # Drop the padded rows/cols, restore NCHW with a cheap leading-axis transpose.
    out = out_pad[:, :m_valid].reshape(cout, b, hp, wp)[:, :, :h, :w]
    out = out.transpose(1, 0, 2, 3)            # (B, Cout, H, W)
    return out, u_new.reshape(-1), v_new.reshape(-1)


# ----------------------------------------------------------------------------
# Pure-JAX reference (for correctness check).
# ----------------------------------------------------------------------------
def _reference(x, weight, bias, u, v):
    cout = weight.shape[0]
    w_mat = weight.reshape(cout, -1)
    for _ in range(POWER_ITERATIONS):
        v = w_mat.T @ u
        v = v / (jnp.linalg.norm(v) + EPS)
        u = w_mat @ v
        u = u / (jnp.linalg.norm(u) + EPS)
    sigma = u @ w_mat @ v
    w_norm = (w_mat / sigma).reshape(weight.shape)
    out = lax.conv_general_dilated(
        x, w_norm, window_strides=(1, 1), padding=((1, 1), (1, 1)),
        dimension_numbers=("NCHW", "OIHW", "NCHW"))
    return out + bias.reshape(1, -1, 1, 1), u, v


if __name__ == "__main__":
    B, Cin, H, W = 2, 4, 16, 16
    Cout, KH, KW = 8, 3, 3

    key = jax.random.PRNGKey(0)
    kx, kw_, kb, ku, kv = jax.random.split(key, 5)
    x = jax.random.normal(kx, (B, Cin, H, W), jnp.float32)
    weight = jax.random.normal(kw_, (Cout, Cin, KH, KW), jnp.float32) * 0.1
    bias = jax.random.normal(kb, (Cout,), jnp.float32) * 0.1
    # u / v as in SpectralNorm._make_params: normal(0,1) then l2-normalized.
    u0 = jax.random.normal(ku, (Cout,), jnp.float32)
    v0 = jax.random.normal(kv, (Cin * KH * KW,), jnp.float32)
    u0 = u0 / (jnp.linalg.norm(u0) + EPS)
    v0 = v0 / (jnp.linalg.norm(v0) + EPS)

    out, u_new, v_new = spectral_norm_conv_forward(x, weight, bias, u0, v0)
    out = jax.block_until_ready(out)

    ref_out, ref_u, ref_v = _reference(x, weight, bias, u0, v0)
    ref_out = jax.block_until_ready(ref_out)
    np.testing.assert_allclose(np.asarray(out), np.asarray(ref_out), rtol=1e-4, atol=1e-4)
    np.testing.assert_allclose(np.asarray(u_new), np.asarray(ref_u), rtol=1e-4, atol=1e-4)
    np.testing.assert_allclose(np.asarray(v_new), np.asarray(ref_v), rtol=1e-4, atol=1e-4)

    print("KERNEL_OK")
</pallas_src>

<mosaic_0001>
module attributes {stable_mosaic.version = 11 : i64} {
  func.func @_fused_spectral_conv_kernel(%arg0: memref<8x36xf32, #tpu.memory_space<vmem>>, %arg1: memref<9x8x4xf32, #tpu.memory_space<vmem>>, %arg2: memref<1x8xf32, #tpu.memory_space<vmem>>, %arg3: memref<1x36xf32, #tpu.memory_space<vmem>>, %arg4: memref<8x1xf32, #tpu.memory_space<vmem>>, %arg5: memref<4x896xf32, #tpu.memory_space<vmem>>, %arg6: memref<8x768xf32, #tpu.memory_space<vmem>>, %arg7: memref<1x8xf32, #tpu.memory_space<vmem>>, %arg8: memref<1x36xf32, #tpu.memory_space<vmem>>) attributes {dimension_semantics = [], scalar_prefetch = 0 : i64, scratch_operands = 0 : i64, tpu.core_type = #tpu.core_type<tc>} {
    %c0 = arith.constant 0 : index
    %c0_0 = arith.constant 0 : index
    %0 = vector.load %arg0[%c0, %c0_0] : memref<8x36xf32, #tpu.memory_space<vmem>>, vector<8x36xf32>
    %c0_1 = arith.constant 0 : index
    %c0_2 = arith.constant 0 : index
    %1 = vector.load %arg2[%c0_1, %c0_2] : memref<1x8xf32, #tpu.memory_space<vmem>>, vector<1x8xf32>
    %cst = arith.constant dense<0.000000e+00> : vector<1x36xf32>
    %2 = tpu.matmul %1, %0, %cst {dimension_numbers = #tpu.dot_dimension_numbers<[1], [0], [0], [1], [0, 0, 1, 1], [], []>} : vector<1x8xf32>, vector<8x36xf32>, vector<1x36xf32> -> vector<1x36xf32>
    %3 = arith.mulf %2, %2 : vector<1x36xf32>
    %4 = vector.shape_cast %3 : vector<1x36xf32> to vector<1x1x36xf32>
    %cst_3 = arith.constant dense<0.000000e+00> : vector<1xf32>
    %5 = vector.multi_reduction <add>, %4, %cst_3 [1, 2] : vector<1x1x36xf32> to vector<1xf32>
    %6 = vector.shape_cast %5 : vector<1xf32> to vector<1x1x1xf32>
    %7 = vector.extract %6[0, 0, 0] : f32 from vector<1x1x1xf32>
    %8 = math.sqrt %7 : f32
    %cst_4 = arith.constant 9.99999996E-13 : f32
    %9 = arith.addf %8, %cst_4 : f32
    %cst_5 = arith.constant 1.000000e+00 : f32
    %10 = arith.divf %cst_5, %9 : f32
    %11 = vector.broadcast %10 : f32 to vector<1x36xf32>
    %12 = arith.mulf %2, %11 : vector<1x36xf32>
    %cst_6 = arith.constant dense<0.000000e+00> : vector<1x8xf32>
    %13 = tpu.matmul %12, %0, %cst_6 {dimension_numbers = #tpu.dot_dimension_numbers<[1], [1], [0], [0], [0, 0, 1, 0], [], []>} : vector<1x36xf32>, vector<8x36xf32>, vector<1x8xf32> -> vector<1x8xf32>
    %14 = arith.mulf %13, %13 : vector<1x8xf32>
    %15 = vector.shape_cast %14 : vector<1x8xf32> to vector<1x1x8xf32>
    %cst_7 = arith.constant dense<0.000000e+00> : vector<1xf32>
    %16 = vector.multi_reduction <add>, %15, %cst_7 [1, 2] : vector<1x1x8xf32> to vector<1xf32>
    %17 = vector.shape_cast %16 : vector<1xf32> to vector<1x1x1xf32>
    %18 = vector.extract %17[0, 0, 0] : f32 from vector<1x1x1xf32>
    %19 = math.sqrt %18 : f32
    %cst_8 = arith.constant 9.99999996E-13 : f32
    %20 = arith.addf %19, %cst_8 : f32
    %cst_9 = arith.constant 1.000000e+00 : f32
    %21 = arith.divf %cst_9, %20 : f32
    %22 = vector.broadcast %21 : f32 to vector<1x8xf32>
    %23 = arith.mulf %13, %22 : vector<1x8xf32>
    %cst_10 = arith.constant dense<0.000000e+00> : vector<1x36xf32>
    %24 = tpu.matmul %23, %0, %cst_10 {dimension_numbers = #tpu.dot_dimension_numbers<[1], [0], [0], [1], [0, 0, 1, 1], [], []>} : vector<1x8xf32>, vector<8x36xf32>, vector<1x36xf32> -> vector<1x36xf32>
    %25 = arith.mulf %24, %24 : vector<1x36xf32>
    %26 = vector.shape_cast %25 : vector<1x36xf32> to vector<1x1x36xf32>
    %cst_11 = arith.constant dense<0.000000e+00> : vector<1xf32>
    %27 = vector.multi_reduction <add>, %26, %cst_11 [1, 2] : vector<1x1x36xf32> to vector<1xf32>
    %28 = vector.shape_cast %27 : vector<1xf32> to vector<1x1x1xf32>
    %29 = vector.extract %28[0, 0, 0] : f32 from vector<1x1x1xf32>
    %30 = math.sqrt %29 : f32
    %cst_12 = arith.constant 9.99999996E-13 : f32
    %31 = arith.addf %30, %cst_12 : f32
    %cst_13 = arith.constant 1.000000e+00 : f32
    %32 = arith.divf %cst_13, %31 : f32
    %33 = vector.broadcast %32 : f32 to vector<1x36xf32>
    %34 = arith.mulf %24, %33 : vector<1x36xf32>
    %cst_14 = arith.constant dense<0.000000e+00> : vector<1x8xf32>
    %35 = tpu.matmul %34, %0, %cst_14 {dimension_numbers = #tpu.dot_dimension_numbers<[1], [1], [0], [0], [0, 0, 1, 0], [], []>} : vector<1x36xf32>, vector<8x36xf32>, vector<1x8xf32> -> vector<1x8xf32>
    %36 = arith.mulf %35, %35 : vector<1x8xf32>
    %37 = vector.shape_cast %36 : vector<1x8xf32> to vector<1x1x8xf32>
    %cst_15 = arith.constant dense<0.000000e+00> : vector<1xf32>
    %38 = vector.multi_reduction <add>, %37, %cst_15 [1, 2] : vector<1x1x8xf32> to vector<1xf32>
    %39 = vector.shape_cast %38 : vector<1xf32> to vector<1x1x1xf32>
    %40 = vector.extract %39[0, 0, 0] : f32 from vector<1x1x1xf32>
    %41 = math.sqrt %40 : f32
    %cst_16 = arith.constant 9.99999996E-13 : f32
    %42 = arith.addf %41, %cst_16 : f32
    %cst_17 = arith.constant 1.000000e+00 : f32
    %43 = arith.divf %cst_17, %42 : f32
    %44 = vector.broadcast %43 : f32 to vector<1x8xf32>
    %45 = arith.mulf %35, %44 : vector<1x8xf32>
    %cst_18 = arith.constant dense<0.000000e+00> : vector<1x36xf32>
    %46 = tpu.matmul %45, %0, %cst_18 {dimension_numbers = #tpu.dot_dimension_numbers<[1], [0], [0], [1], [0, 0, 1, 1], [], []>} : vector<1x8xf32>, vector<8x36xf32>, vector<1x36xf32> -> vector<1x36xf32>
    %47 = arith.mulf %46, %34 : vector<1x36xf32>
    %48 = vector.shape_cast %47 : vector<1x36xf32> to vector<1x1x36xf32>
    %cst_19 = arith.constant dense<0.000000e+00> : vector<1xf32>
    %49 = vector.multi_reduction <add>, %48, %cst_19 [1, 2] : vector<1x1x36xf32> to vector<1xf32>
    %50 = vector.shape_cast %49 : vector<1xf32> to vector<1x1x1xf32>
    %51 = vector.extract %50[0, 0, 0] : f32 from vector<1x1x1xf32>
    %cst_20 = arith.constant 1.000000e+00 : f32
    %52 = arith.divf %cst_20, %51 : f32
    %c0_21 = arith.constant 0 : index
    %c0_22 = arith.constant 0 : index
    %53 = vector.load %arg5[%c0_21, %c0_22] : memref<4x896xf32, #tpu.memory_space<vmem>>, vector<4x896xf32>
    %cst_23 = arith.constant 0.000000e+00 : f32
    %54 = vector.broadcast %cst_23 : f32 to vector<8x768xf32>
    %c0_24 = arith.constant 0 : index
    %c0_25 = arith.constant 0 : index
    %c0_26 = arith.constant 0 : index
    %55 = vector.load %arg1[%c0_24, %c0_25, %c0_26] : memref<9x8x4xf32, #tpu.memory_space<vmem>>, vector<1x8x4xf32>
    %56 = vector.shape_cast %55 : vector<1x8x4xf32> to vector<8x4xf32>
    %57 = vector.extract_strided_slice %53 {offsets = [0, 0], sizes = [4, 768], strides = [1, 1]} : vector<4x896xf32> to vector<4x768xf32>
    %cst_27 = arith.constant dense<0.000000e+00> : vector<8x768xf32>
    %58 = tpu.matmul %56, %57, %cst_27 {dimension_numbers = #tpu.dot_dimension_numbers<[1], [0], [0], [1], [0, 0, 1, 1], [], []>} : vector<8x4xf32>, vector<4x768xf32>, vector<8x768xf32> -> vector<8x768xf32>
    %59 = arith.addf %54, %58 : vector<8x768xf32>
    %c1 = arith.constant 1 : index
    %c0_28 = arith.constant 0 : index
    %c0_29 = arith.constant 0 : index
    %60 = vector.load %arg1[%c1, %c0_28, %c0_29] : memref<9x8x4xf32, #tpu.memory_space<vmem>>, vector<1x8x4xf32>
    %61 = vector.shape_cast %60 : vector<1x8x4xf32> to vector<8x4xf32>
    %62 = vector.extract_strided_slice %53 {offsets = [0, 1], sizes = [4, 768], strides = [1, 1]} : vector<4x896xf32> to vector<4x768xf32>
    %cst_30 = arith.constant dense<0.000000e+00> : vector<8x768xf32>
    %63 = tpu.matmul %61, %62, %cst_30 {dimension_numbers = #tpu.dot_dimension_numbers<[1], [0], [0], [1], [0, 0, 1, 1], [], []>} : vector<8x4xf32>, vector<4x768xf32>, vector<8x768xf32> -> vector<8x768xf32>
    %64 = arith.addf %59, %63 : vector<8x768xf32>
    %c2 = arith.constant 2 : index
    %c0_31 = arith.constant 0 : index
    %c0_32 = arith.constant 0 : index
    %65 = vector.load %arg1[%c2, %c0_31, %c0_32] : memref<9x8x4xf32, #tpu.memory_space<vmem>>, vector<1x8x4xf32>
    %66 = vector.shape_cast %65 : vector<1x8x4xf32> to vector<8x4xf32>
    %67 = vector.extract_strided_slice %53 {offsets = [0, 2], sizes = [4, 768], strides = [1, 1]} : vector<4x896xf32> to vector<4x768xf32>
    %cst_33 = arith.constant dense<0.000000e+00> : vector<8x768xf32>
    %68 = tpu.matmul %66, %67, %cst_33 {dimension_numbers = #tpu.dot_dimension_numbers<[1], [0], [0], [1], [0, 0, 1, 1], [], []>} : vector<8x4xf32>, vector<4x768xf32>, vector<8x768xf32> -> vector<8x768xf32>
    %69 = arith.addf %64, %68 : vector<8x768xf32>
    %c3 = arith.constant 3 : index
    %c0_34 = arith.constant 0 : index
    %c0_35 = arith.constant 0 : index
    %70 = vector.load %arg1[%c3, %c0_34, %c0_35] : memref<9x8x4xf32, #tpu.memory_space<vmem>>, vector<1x8x4xf32>
    %71 = vector.shape_cast %70 : vector<1x8x4xf32> to vector<8x4xf32>
    %72 = vector.extract_strided_slice %53 {offsets = [0, 18], sizes = [4, 768], strides = [1, 1]} : vector<4x896xf32> to vector<4x768xf32>
    %cst_36 = arith.constant dense<0.000000e+00> : vector<8x768xf32>
    %73 = tpu.matmul %71, %72, %cst_36 {dimension_numbers = #tpu.dot_dimension_numbers<[1], [0], [0], [1], [0, 0, 1, 1], [], []>} : vector<8x4xf32>, vector<4x768xf32>, vector<8x768xf32> -> vector<8x768xf32>
    %74 = arith.addf %69, %73 : vector<8x768xf32>
    %c4 = arith.constant 4 : index
    %c0_37 = arith.constant 0 : index
    %c0_38 = arith.constant 0 : index
    %75 = vector.load %arg1[%c4, %c0_37, %c0_38] : memref<9x8x4xf32, #tpu.memory_space<vmem>>, vector<1x8x4xf32>
    %76 = vector.shape_cast %75 : vector<1x8x4xf32> to vector<8x4xf32>
    %77 = vector.extract_strided_slice %53 {offsets = [0, 19], sizes = [4, 768], strides = [1, 1]} : vector<4x896xf32> to vector<4x768xf32>
    %cst_39 = arith.constant dense<0.000000e+00> : vector<8x768xf32>
    %78 = tpu.matmul %76, %77, %cst_39 {dimension_numbers = #tpu.dot_dimension_numbers<[1], [0], [0], [1], [0, 0, 1, 1], [], []>} : vector<8x4xf32>, vector<4x768xf32>, vector<8x768xf32> -> vector<8x768xf32>
    %79 = arith.addf %74, %78 : vector<8x768xf32>
    %c5 = arith.constant 5 : index
    %c0_40 = arith.constant 0 : index
    %c0_41 = arith.constant 0 : index
    %80 = vector.load %arg1[%c5, %c0_40, %c0_41] : memref<9x8x4xf32, #tpu.memory_space<vmem>>, vector<1x8x4xf32>
    %81 = vector.shape_cast %80 : vector<1x8x4xf32> to vector<8x4xf32>
    %82 = vector.extract_strided_slice %53 {offsets = [0, 20], sizes = [4, 768], strides = [1, 1]} : vector<4x896xf32> to vector<4x768xf32>
    %cst_42 = arith.constant dense<0.000000e+00> : vector<8x768xf32>
    %83 = tpu.matmul %81, %82, %cst_42 {dimension_numbers = #tpu.dot_dimension_numbers<[1], [0], [0], [1], [0, 0, 1, 1], [], []>} : vector<8x4xf32>, vector<4x768xf32>, vector<8x768xf32> -> vector<8x768xf32>
    %84 = arith.addf %79, %83 : vector<8x768xf32>
    %c6 = arith.constant 6 : index
    %c0_43 = arith.constant 0 : index
    %c0_44 = arith.constant 0 : index
    %85 = vector.load %arg1[%c6, %c0_43, %c0_44] : memref<9x8x4xf32, #tpu.memory_space<vmem>>, vector<1x8x4xf32>
    %86 = vector.shape_cast %85 : vector<1x8x4xf32> to vector<8x4xf32>
    %87 = vector.extract_strided_slice %53 {offsets = [0, 36], sizes = [4, 768], strides = [1, 1]} : vector<4x896xf32> to vector<4x768xf32>
    %cst_45 = arith.constant dense<0.000000e+00> : vector<8x768xf32>
    %88 = tpu.matmul %86, %87, %cst_45 {dimension_numbers = #tpu.dot_dimension_numbers<[1], [0], [0], [1], [0, 0, 1, 1], [], []>} : vector<8x4xf32>, vector<4x768xf32>, vector<8x768xf32> -> vector<8x768xf32>
    %89 = arith.addf %84, %88 : vector<8x768xf32>
    %c7 = arith.constant 7 : index
    %c0_46 = arith.constant 0 : index
    %c0_47 = arith.constant 0 : index
    %90 = vector.load %arg1[%c7, %c0_46, %c0_47] : memref<9x8x4xf32, #tpu.memory_space<vmem>>, vector<1x8x4xf32>
    %91 = vector.shape_cast %90 : vector<1x8x4xf32> to vector<8x4xf32>
    %92 = vector.extract_strided_slice %53 {offsets = [0, 37], sizes = [4, 768], strides = [1, 1]} : vector<4x896xf32> to vector<4x768xf32>
    %cst_48 = arith.constant dense<0.000000e+00> : vector<8x768xf32>
    %93 = tpu.matmul %91, %92, %cst_48 {dimension_numbers = #tpu.dot_dimension_numbers<[1], [0], [0], [1], [0, 0, 1, 1], [], []>} : vector<8x4xf32>, vector<4x768xf32>, vector<8x768xf32> -> vector<8x768xf32>
    %94 = arith.addf %89, %93 : vector<8x768xf32>
    %c8 = arith.constant 8 : index
    %c0_49 = arith.constant 0 : index
    %c0_50 = arith.constant 0 : index
    %95 = vector.load %arg1[%c8, %c0_49, %c0_50] : memref<9x8x4xf32, #tpu.memory_space<vmem>>, vector<1x8x4xf32>
    %96 = vector.shape_cast %95 : vector<1x8x4xf32> to vector<8x4xf32>
    %97 = vector.extract_strided_slice %53 {offsets = [0, 38], sizes = [4, 768], strides = [1, 1]} : vector<4x896xf32> to vector<4x768xf32>
    %cst_51 = arith.constant dense<0.000000e+00> : vector<8x768xf32>
    %98 = tpu.matmul %96, %97, %cst_51 {dimension_numbers = #tpu.dot_dimension_numbers<[1], [0], [0], [1], [0, 0, 1, 1], [], []>} : vector<8x4xf32>, vector<4x768xf32>, vector<8x768xf32> -> vector<8x768xf32>
    %99 = arith.addf %94, %98 : vector<8x768xf32>
    %100 = vector.broadcast %52 : f32 to vector<8x768xf32>
    %101 = arith.mulf %99, %100 : vector<8x768xf32>
    %c0_52 = arith.constant 0 : index
    %c0_53 = arith.constant 0 : index
    %102 = vector.load %arg4[%c0_52, %c0_53] : memref<8x1xf32, #tpu.memory_space<vmem>>, vector<8x1xf32>
    %103 = vector.broadcast %102 : vector<8x1xf32> to vector<8x768xf32>
    %104 = arith.addf %101, %103 : vector<8x768xf32>
    %c0_54 = arith.constant 0 : index
    %c0_55 = arith.constant 0 : index
    %105 = vector.load %arg6[%c0_54, %c0_55] : memref<8x768xf32, #tpu.memory_space<vmem>>, vector<8x768xf32>
    tpu.vector_store %arg6[%c0_54, %c0_55], %104 {strides = array<i32>} : memref<8x768xf32, #tpu.memory_space<vmem>>, vector<8x768xf32>,
    %c0_56 = arith.constant 0 : index
    %c0_57 = arith.constant 0 : index
    %106 = vector.load %arg7[%c0_56, %c0_57] : memref<1x8xf32, #tpu.memory_space<vmem>>, vector<1x8xf32>
    tpu.vector_store %arg7[%c0_56, %c0_57], %45 {strides = array<i32>} : memref<1x8xf32, #tpu.memory_space<vmem>>, vector<1x8xf32>,
    %c0_58 = arith.constant 0 : index
    %c0_59 = arith.constant 0 : index
    %107 = vector.load %arg8[%c0_58, %c0_59] : memref<1x36xf32, #tpu.memory_space<vmem>>, vector<1x36xf32>
    tpu.vector_store %arg8[%c0_58, %c0_59], %34 {strides = array<i32>} : memref<1x36xf32, #tpu.memory_space<vmem>>, vector<1x36xf32>,
    return
  }
}

</mosaic_0001>

<bundles_post_ra>
// kernel: tpu_custom_call.1
= control target key start
LH: loop header
LB: loop body
LE: loop exit
PB: predicated region body
PF: predicated region fallthrough
CT: control target
= control target key end

     0   :  { %14 = vsyncpa [#allocation3], 0  ;;  %vm30_vm0 = vcmask 64512   ;;  %v3194_v2 = vmov 0.0   ;;  %vm3195_vm1 = vmmov 0   ;;  %s3678_s0 = inlined_call_operand.vmem [shape: f32[8,36], index: 0, kind: input, shape index: {}]   ;;  %s3679_s1 = inlined_call_operand.vmem [shape: f32[9,8,4], index: 1, kind: input, shape index: {}]   ;;  %s3680_s2 = inlined_call_operand.vmem [shape: f32[1,8], index: 2, kind: input, shape index: {}]   ;;  %s3681_s3 = inlined_call_operand.vmem [shape: f32[1,36], index: 3, kind: input, shape index: {}]   ;;  %s3682_s4 = inlined_call_operand.vmem [shape: f32[8,1], index: 4, kind: input, shape index: {}]   ;;  %s3683_s5 = inlined_call_operand.vmem [shape: f32[4,896], index: 5, kind: input, shape index: {}]   ;;  %s3684_s6 = inlined_call_operand.hbm [shape: f32[8,768], index: 6, kind: output, shape index: {0}]   ;;  %s3685_s7 = inlined_call_operand.hbm [shape: f32[1,8], index: 7, kind: output, shape index: {1}]   ;;  %s3686_s8 = inlined_call_operand.hbm [shape: f32[1,36], index: 8, kind: output, shape index: {2}]  }
   0x1   :  { %v3256_v0 = vld [vmem:[%s3678_s0] sm:$0xff]  ;;  %2986 = vmatprep.subr.mxu0 %v3194_v2  ;;  %2988 = vmatprep.mubr.msk.f32.mxu0 %vm3195_vm1, %v3194_v2 }
   0x2   :  { %v29_v1 = vld [vmem:[%s3680_s2] sm:$0x1] }
   0x3   :  { %15 = vsyncpa [#allocation5], 0  ;;  %2987 = vmatpush3.msra.mxu0 %v3256_v0  ;;  %864 = vmatprep.mubr.f32.mxu1 %v3194_v2  ;;  %vm105_vm2 = vcmask 286720   ;;  %vm131_vm3 = vcmask 293888   ;;  %vm209_vm6 = vcmask 57344   ;;  %s3196_s22 = smov 127  }
   0x4   :  { %2989 = vmatmul.mubr.msk.f32.vlgmr.msra.gmra.mrb[0].mxu0 %vm30_vm0, %v29_v1  ;;  %2991 = vmatprep.subr.mxu0 %v3194_v2  ;;  %s3197_s27 = smov 126   ;;  %s3198_s28 = smov 110   ;;  %vm559_vm11 = vcmask 1043456   ;;  %vm555_vm14 = vcmask 31744   ;;  %vm548_vm15 = vcmask 1039360  }
   0x5   :  { %2993 = vmatprep.mubr.msk.f32.mxu0 %vm3195_vm1, %v3194_v2 }
   0xa   :  { %2992 = vmatpush3.xpose.msk.msra.mxu0 %vm131_vm3, %v3256_v0 }
   0xb   :  { %2996 = vmatprep.subr.mxu0 %v3194_v2 }
  0xd7   :  { %v100_v3 = vpop.f32.mrb[0].mxu0 }
  0xd8   :  { %v2990_v4 = vpop.f32.mrb[1].mxu0  ;;  %v104_v5 = vmul.f32 %v100_v3, %v100_v3 }
  0xda   :  { %v106_v6 = vsel %vm105_vm2, %v104_v5, 0.0 }
  0xdb   :  { %107 = vadd.xlane.f32.xlu0 %v106_v6 }
 0x168   :  { %v108_v7 = vpop.xlane.xlu0 %107 }
 0x169   :  { %v109_v8 = vrot.slane %v108_v7, 4 }
 0x16b   :  { %v110_v9 = vadd.f32 %v109_v8, %v108_v7 }
 0x16d   :  { %v111_v10 = vrot.slane %v110_v9, 2 }
 0x16f   :  { %v112_v11 = vadd.f32 %v111_v10, %v110_v9 }
 0x171   :  { %v113_v12 = vrot.slane %v112_v11, 1 }
 0x173   :  { %v114_v13 = vadd.f32 %v113_v12, %v112_v11 }
 0x175   :  { %3059 = vpush %v114_v13 }
 0x1a6   :  { %s3060_s0 = spop %3059 }
 0x1a7   :  { %v116_v14 = vstv %s3060_s0  ;;  %s3199_s0 = smov 109  }
 0x1a8   :  { %3106 = vrsqrt.f32 %v116_v14  ;;  %vm119_vm4 = vcmp.eq.f32.partialorder %v116_v14, inf  ;;  %v122_v17 = vand.u32 2147483648, %v116_v14  ;;  %vm121_vm5 = vcmp.eq.f32.partialorder %v116_v14, 0.0 }
 0x1b2   :  { %v3107_v15 = vpop.eup %3106 }
 0x1b3   :  { %v118_v16 = vmul.f32 %v3107_v15, %v116_v14  ;;  %v3309_v15 = vld [vmem:[%s3683_s5] sm:$0xff] }
 0x1b5   :  { %v120_v18 = vsel %vm119_vm4, %v116_v14, %v118_v16  ;;  %v3314_v16 = vcombine.high %v3309_v15, %v3309_v15  ;;  %vm1543_vm4 = vcmask 891904  }
 0x1b6   :  { %v123_v19 = vsel %vm121_vm5, %v122_v17, %v120_v18  ;;  %v3325_v18 = vld [vmem:[%s3683_s5 + $0x10] sm:$0xff]  ;;  %vm2057_vm5 = vcmask 752640  }
 0x1b7   :  { %3061 = vpush %v123_v19  ;;  %v3331_v19 = vld [vmem:[%s3683_s5 + $0x18] sm:$0xf]  ;;  %2897 = vmatprep.subr.msk.mxu1 %vm559_vm11, %v3314_v16 }
 0x1b8   :  { %2898 = vmatpush1.msk.msra.mxu1 %vm559_vm11, %v3309_v15 }
 0x1e8   :  { %s3062_s2 = spop %3061 }
 0x1e9   :  { %s125_s30 = sadd.f32 1e-12, %s3062_s2  ;;  %s3200_s2 = smov 108  }
 0x1eb   :  { %v126_v20 = vstv %s125_s30  ;;  %s3201_s30 = smov 92  }
 0x1ec   :  { %3108 = vrcp.f32 %v126_v20  ;;  %v3336_v20 = vcombine.high %v3325_v18, %v3325_v18 }
 0x1ee   :  { %2903 = vmatprep.subr.msk.mxu1 %vm559_vm11, %v3336_v20 }
 0x1f6   :  { %v3109_v21 = vpop.eup %3108 }
 0x1f7   :  { %3063 = vpush %v3109_v21 }
 0x228   :  { %s3064_s9 = spop %3063 }
 0x229   :  { %v129_v22 = vstv %s3064_s9  ;;  %s3202_s9 = smov 91  }
 0x22a   :  { %v130_v23 = vmul.f32 %v129_v22, %v100_v3 }
 0x22c   :  { %2994 = vmatmul.mubr.msk.f32.vlgmr.msra.gmra.mrb[2].mxu0 %vm131_vm3, %v130_v23 }
 0x22d   :  { %2997 = vmatpush3.msra.mxu0 %v3256_v0  ;;  %2998 = vmatprep.mubr.msk.f32.mxu0 %vm3195_vm1, %v3194_v2 }
 0x22e   :  { %3001 = vmatprep.subr.mxu0 %v3194_v2 }
 0x2ff   :  { %v204_v24 = vpop.f32.mrb[2].mxu0 }
 0x300   :  { %v208_v25 = vmul.f32 %v204_v24, %v204_v24  ;;  %v2995_v26 = vpop.f32.mrb[3].mxu0 }
 0x301   :  { %v3362_v26 = vld [vmem:[%s3679_s1] sm:$0xff] }
 0x302   :  { %v210_v27 = vsel %vm209_vm6, %v208_v25, 0.0  ;;  %2899 = vmatmul.mubr.msk.f32.vlgmr.msra.gmra.mrb[0].mxu1 %vm555_vm14, %v3362_v26 }
 0x303   :  { %211 = vadd.xlane.f32.xlu0 %v210_v27  ;;  %2904 = vmatpush1.msk.msra.mxu1 %vm559_vm11, %v3325_v18 }
 0x304   :  { %1006 = vmatprep.mubr.f32.mxu1 %v3194_v2 }
 0x306   :  { %2905 = vmatmul.mubr.msk.f32.vlgmr.msra.gmra.mrb[2].mxu1 %vm555_vm14, %v3362_v26 }
 0x307   :  { %1115 = vmatprep.mubr.f32.mxu1 %v3194_v2 }
 0x319   :  { %536 = vrot.lane.b32.xlu0 %v3314_v16, %s3196_s22 }
 0x31d   :  { %542 = vrot.lane.b32.xlu0 %v3325_v18, %s3196_s22 }
 0x321   :  { %546 = vrot.lane.b32.xlu0 %v3331_v19, %s3196_s22 }
 0x390   :  { %v212_v28 = vpop.xlane.xlu0 %211 }
 0x391   :  { %v213_v29 = vrot.slane %v212_v28, 4 }
 0x393   :  { %v214_v30 = vadd.f32 %v213_v29, %v212_v28 }
 0x395   :  { %v215_v31 = vrot.slane %v214_v30, 2 }
 0x397   :  { %v216_v32 = vadd.f32 %v215_v31, %v214_v30  ;;  %v3398_v30 = vpop.permute.xlu0 %536 }
 0x399   :  { %v217_v33 = vrot.slane %v216_v32, 1 }
 0x39b   :  { %v218_v34 = vadd.f32 %v217_v33, %v216_v32  ;;  %v543_v33 = vpop.permute.xlu0 %542 }
 0x39d   :  { %3065 = vpush %v218_v34 }
 0x3ce   :  { %s3066_s10 = spop %3065 }
 0x3cf   :  { %v220_v35 = vstv %s3066_s10 }
 0x3d0   :  { %3110 = vrsqrt.f32 %v220_v35  ;;  %vm223_vm7 = vcmp.eq.f32.partialorder %v220_v35, inf  ;;  %v226_v38 = vand.u32 2147483648, %v220_v35  ;;  %vm225_vm8 = vcmp.eq.f32.partialorder %v220_v35, 0.0 }
 0x3da   :  { %v3111_v36 = vpop.eup %3110 }
 0x3db   :  { %v222_v37 = vmul.f32 %v3111_v36, %v220_v35  ;;  %v3410_v36 = vpop.permute.xlu0 %546 }
 0x3dd   :  { %v224_v39 = vsel %vm223_vm7, %v220_v35, %v222_v37  ;;  %vm2571_vm7 = vcmask 736256  }
 0x3de   :  { %v227_v40 = vsel %vm225_vm8, %v226_v38, %v224_v39 }
 0x3df   :  { %3067 = vpush %v227_v40 }
 0x410   :  { %s3068_s11 = spop %3067 }
 0x411   :  { %s229_s12 = sadd.f32 1e-12, %s3068_s11 }
 0x413   :  { %v230_v41 = vstv %s229_s12  ;;  %s3203_s12 = smov 90  }
 0x414   :  { %3112 = vrcp.f32 %v230_v41 }
 0x41e   :  { %v3113_v42 = vpop.eup %3112 }
 0x41f   :  { %3069 = vpush %v3113_v42 }
 0x450   :  { %s3070_s13 = spop %3069 }
 0x451   :  { %v233_v43 = vstv %s3070_s13 }
 0x452   :  { %v234_v44 = vmul.f32 %v233_v43, %v204_v24 }
 0x454   :  { %2999 = vmatmul.mubr.msk.f32.vlgmr.msra.gmra.mrb[4].mxu0 %vm30_vm0, %v234_v44 }
 0x455   :  { %3002 = vmatpush3.xpose.msk.msra.mxu0 %vm131_vm3, %v3256_v0  ;;  %3003 = vmatprep.mubr.msk.f32.mxu0 %vm3195_vm1, %v3194_v2 }
 0x456   :  { %3006 = vmatprep.subr.mxu0 %v3194_v2 }
 0x527   :  { %v304_v45 = vpop.f32.mrb[4].mxu0 }
 0x528   :  { %v3000_v46 = vpop.f32.mrb[5].mxu0  ;;  %v308_v47 = vmul.f32 %v304_v45, %v304_v45 }
 0x52a   :  { %v309_v48 = vsel %vm105_vm2, %v308_v47, 0.0 }
 0x52b   :  { %310 = vadd.xlane.f32.xlu1 %v309_v48 }
 0x5b8   :  { %v311_v49 = vpop.xlane.xlu1 %310 }
 0x5b9   :  { %v312_v50 = vrot.slane %v311_v49, 4 }
 0x5bb   :  { %v313_v51 = vadd.f32 %v312_v50, %v311_v49 }
 0x5bd   :  { %v314_v52 = vrot.slane %v313_v51, 2 }
 0x5bf   :  { %v315_v53 = vadd.f32 %v314_v52, %v313_v51 }
 0x5c1   :  { %v316_v54 = vrot.slane %v315_v53, 1 }
 0x5c3   :  { %v317_v55 = vadd.f32 %v316_v54, %v315_v53 }
 0x5c5   :  { %3071 = vpush %v317_v55 }
 0x5f6   :  { %s3072_s14 = spop %3071 }
 0x5f7   :  { %v319_v56 = vstv %s3072_s14 }
 0x5f8   :  { %3114 = vrsqrt.f32 %v319_v56  ;;  %vm322_vm9 = vcmp.eq.f32.partialorder %v319_v56, inf  ;;  %v325_v59 = vand.u32 2147483648, %v319_v56  ;;  %vm324_vm10 = vcmp.eq.f32.partialorder %v319_v56, 0.0 }
 0x602   :  { %v3115_v57 = vpop.eup %3114 }
 0x603   :  { %v321_v58 = vmul.f32 %v3115_v57, %v319_v56 }
 0x605   :  { %v323_v60 = vsel %vm322_vm9, %v319_v56, %v321_v58  ;;  %v3457_v58 = vld [vmem:[%s3679_s1 + $0x18] sm:$0xff] }
 0x606   :  { %v326_v61 = vsel %vm324_vm10, %v325_v59, %v323_v60 }
 0x607   :  { %3073 = vpush %v326_v61 }
 0x638   :  { %s3074_s15 = spop %3073 }
 0x639   :  { %s328_s16 = sadd.f32 1e-12, %s3074_s15 }
 0x63b   :  { %v329_v62 = vstv %s328_s16 }
 0x63c   :  { %3116 = vrcp.f32 %v329_v62 }
 0x646   :  { %v3117_v63 = vpop.eup %3116 }
 0x647   :  { %3075 = vpush %v3117_v63 }
 0x678   :  { %s3076_s17 = spop %3075 }
 0x679   :  { %v332_v1 = vstv %s3076_s17 }
 0x67a   :  { %v3287_v3 = vmul.f32 %v332_v1, %v304_v45  ;;  %v3429_v45 = vld [vmem:[%s3679_s1 + $0x10] sm:$0xff] }
 0x67c   :  { %2838 = vst.msk [vmem:[#allocation6] sm:$0x1] %vm105_vm2, %v3287_v3  ;;  %3004 = vmatmul.mubr.msk.f32.vlgmr.msra.gmra.mrb[6].mxu0 %vm131_vm3, %v3287_v3  ;;  %vm1286_vm3 = vcmask 900096  }
 0x67d   :  { %3007 = vmatpush3.msra.mxu0 %v3256_v0  ;;  %3008 = vmatprep.mubr.msk.f32.mxu0 %vm3195_vm1, %v3194_v2  ;;  %v3304_v0 = vld [vmem:[%s3683_s5 + $0x8] sm:$0xff]  ;;  %vm1029_vm1 = vcmask 1031168  }
 0x67e   :  { %v3320_v17 = vcombine.high %v3304_v0, %v3304_v0  ;;  %1019 = vrot.lane.b32.xlu0 %v3304_v0, %s3197_s27 }
 0x682   :  { %1025 = vrot.lane.b32.xlu0 %v3336_v20, %s3197_s27 }
 0x686   :  { %1023 = vrot.lane.b32.xlu0 %v3325_v18, %s3197_s27 }
 0x68a   :  { %1274 = vrot.lane.b32.xlu0 %v3314_v16, %s3198_s28 }
 0x68e   :  { %1272 = vrot.lane.b32.xlu0 %v3309_v15, %s3198_s28 }
 0x692   :  { %1284 = vrot.lane.b32.xlu0 %v3331_v19, %s3198_s28 }
 0x696   :  { %1278 = vrot.lane.b32.xlu0 %v3320_v17, %s3198_s28 }
 0x69a   :  { %1533 = vrot.lane.b32.xlu0 %v3304_v0, %s3199_s0 }
 0x69e   :  { %1539 = vrot.lane.b32.xlu0 %v3336_v20, %s3199_s0 }
 0x6a2   :  { %1537 = vrot.lane.b32.xlu0 %v3325_v18, %s3199_s0 }
 0x6a6   :  { %1788 = vrot.lane.b32.xlu0 %v3314_v16, %s3200_s2 }
 0x6aa   :  { %1786 = vrot.lane.b32.xlu0 %v3309_v15, %s3200_s2 }
 0x6ae   :  { %1798 = vrot.lane.b32.xlu0 %v3331_v19, %s3200_s2 }
 0x6b2   :  { %1792 = vrot.lane.b32.xlu0 %v3320_v17, %s3200_s2 }
 0x6b6   :  { %2047 = vrot.lane.b32.xlu0 %v3304_v0, %s3201_s30 }
 0x6ba   :  { %2053 = vrot.lane.b32.xlu0 %v3336_v20, %s3201_s30 }
 0x6be   :  { %2051 = vrot.lane.b32.xlu0 %v3325_v18, %s3201_s30 }
 0x6c2   :  { %2302 = vrot.lane.b32.xlu0 %v3314_v16, %s3202_s9 }
 0x6c6   :  { %2300 = vrot.lane.b32.xlu0 %v3309_v15, %s3202_s9 }
 0x6ca   :  { %2312 = vrot.lane.b32.xlu0 %v3331_v19, %s3202_s9 }
 0x6ce   :  { %2306 = vrot.lane.b32.xlu0 %v3320_v17, %s3202_s9 }
 0x6d2   :  { %2561 = vrot.lane.b32.xlu0 %v3304_v0, %s3203_s12 }
 0x6d6   :  { %2567 = vrot.lane.b32.xlu0 %v3336_v20, %s3203_s12 }
 0x6da   :  { %2565 = vrot.lane.b32.xlu0 %v3325_v18, %s3203_s12 }
 0x6f0   :  { %v1020_v40 = vpop.permute.xlu0 %1019 }
 0x6f4   :  { %v1026_v43 = vpop.permute.xlu0 %1025 }
 0x6f8   :  { %v3433_v47 = vpop.permute.xlu0 %1023 }
 0x6f9   :  { %v1034_v49 = vsel %vm1029_vm1, %v3433_v47, %v1026_v43 }
 0x6fc   :  { %v1275_v53 = vpop.permute.xlu0 %1274 }
 0x700   :  { %v1273_v56 = vpop.permute.xlu0 %1272 }
 0x701   :  { %v1287_v59 = vsel %vm1286_vm3, %v1273_v56, %v1275_v53 }
 0x704   :  { %v1285_v60 = vpop.permute.xlu0 %1284 }
 0x74f   :  { %v3296_v4 = vpop.f32.mrb[6].mxu0 }
 0x750   :  { %v407_v5 = vmul.f32 %v3296_v4, %v3296_v4  ;;  %v3005_v6 = vpop.f32.mrb[7].mxu0 }
 0x752   :  { %v408_v7 = vsel %vm209_vm6, %v407_v5, 0.0 }
 0x753   :  { %409 = vadd.xlane.f32.xlu1 %v408_v7 }
 0x764   :  { %538 = vrot.lane.b32.xlu1 %v3304_v0, %s3196_s22 }
 0x768   :  { %534 = vrot.lane.b32.xlu1 %v3309_v15, %s3196_s22 }
 0x76c   :  { %540 = vrot.lane.b32.xlu1 %v3320_v17, %s3196_s22 }
 0x770   :  { %544 = vrot.lane.b32.xlu1 %v3336_v20, %s3196_s22 }
 0x774   :  { %1017 = vrot.lane.b32.xlu1 %v3314_v16, %s3197_s27 }
 0x778   :  { %1015 = vrot.lane.b32.xlu1 %v3309_v15, %s3197_s27 }
 0x77c   :  { %1027 = vrot.lane.b32.xlu1 %v3331_v19, %s3197_s27 }
 0x780   :  { %1021 = vrot.lane.b32.xlu1 %v3320_v17, %s3197_s27 }
 0x784   :  { %1276 = vrot.lane.b32.xlu1 %v3304_v0, %s3198_s28 }
 0x788   :  { %1282 = vrot.lane.b32.xlu1 %v3336_v20, %s3198_s28 }
 0x78c   :  { %1280 = vrot.lane.b32.xlu1 %v3325_v18, %s3198_s28 }
 0x790   :  { %1531 = vrot.lane.b32.xlu1 %v3314_v16, %s3199_s0 }
 0x794   :  { %1529 = vrot.lane.b32.xlu1 %v3309_v15, %s3199_s0 }
 0x798   :  { %1541 = vrot.lane.b32.xlu1 %v3331_v19, %s3199_s0 }
 0x79c   :  { %1535 = vrot.lane.b32.xlu1 %v3320_v17, %s3199_s0 }
 0x7a0   :  { %1790 = vrot.lane.b32.xlu1 %v3304_v0, %s3200_s2 }
 0x7a4   :  { %1796 = vrot.lane.b32.xlu1 %v3336_v20, %s3200_s2 }
 0x7a8   :  { %1794 = vrot.lane.b32.xlu1 %v3325_v18, %s3200_s2 }
 0x7ac   :  { %2045 = vrot.lane.b32.xlu1 %v3314_v16, %s3201_s30 }
 0x7b0   :  { %2043 = vrot.lane.b32.xlu1 %v3309_v15, %s3201_s30 }
 0x7b4   :  { %2055 = vrot.lane.b32.xlu1 %v3331_v19, %s3201_s30 }
 0x7b8   :  { %2049 = vrot.lane.b32.xlu1 %v3320_v17, %s3201_s30 }
 0x7bc   :  { %2304 = vrot.lane.b32.xlu1 %v3304_v0, %s3202_s9 }
 0x7c0   :  { %2310 = vrot.lane.b32.xlu1 %v3336_v20, %s3202_s9 }
 0x7c4   :  { %2308 = vrot.lane.b32.xlu1 %v3325_v18, %s3202_s9 }
 0x7c8   :  { %2559 = vrot.lane.b32.xlu1 %v3314_v16, %s3203_s12 }
 0x7cc   :  { %2557 = vrot.lane.b32.xlu1 %v3309_v15, %s3203_s12  ;;  %v3498_v15 = vld [vmem:[%s3679_s1 + $0x20] sm:$0xff] }
 0x7d0   :  { %2569 = vrot.lane.b32.xlu1 %v3331_v19, %s3203_s12 }
 0x7d4   :  { %2563 = vrot.lane.b32.xlu1 %v3320_v17, %s3203_s12 }
 0x7e0   :  { %v410_v8 = vpop.xlane.xlu1 %409 }
 0x7e1   :  { %v411_v9 = vrot.slane %v410_v8, 4 }
 0x7e3   :  { %v412_v10 = vadd.f32 %v411_v9, %v410_v8  ;;  %v1279_v8 = vpop.permute.xlu0 %1278 }
 0x7e4   :  { %v539_v28 = vpop.permute.xlu1 %538 }
 0x7e5   :  { %v413_v11 = vrot.slane %v412_v10, 2  ;;  %v550_v31 = vsel %vm548_vm15, %v3398_v30, %v539_v28 }
 0x7e6   :  { %2888 = vmatprep.subr.msk.mxu0 %vm559_vm11, %v550_v31 }
 0x7e7   :  { %v414_v12 = vadd.f32 %v413_v11, %v412_v10  ;;  %v3486_v11 = vpop.permute.xlu0 %1533 }
 0x7e8   :  { %v535_v32 = vpop.permute.xlu1 %534 }
 0x7e9   :  { %v415_v13 = vrot.slane %v414_v12, 1  ;;  %v549_v6 = vsel %vm548_vm15, %v535_v32, %v3398_v30 }
 0x7eb   :  { %v416_v14 = vadd.f32 %v415_v13, %v414_v12  ;;  %v1540_v16 = vpop.permute.xlu0 %1539 }
 0x7ec   :  { %v541_v34 = vpop.permute.xlu1 %540 }
 0x7ed   :  { %3077 = vpush %v416_v14  ;;  %v3408_v35 = vsel %vm548_vm15, %v539_v28, %v541_v34  ;;  %v552_v7 = vsel %vm548_vm15, %v541_v34, %v543_v33 }
 0x7f0   :  { %v3414_v38 = vpop.permute.xlu1 %544 }
 0x7f1   :  { %v3418_v39 = vsel %vm548_vm15, %v543_v33, %v3414_v38  ;;  %v554_v10 = vsel %vm548_vm15, %v3414_v38, %v3410_v36 }
 0x7f4   :  { %v1018_v41 = vpop.permute.xlu1 %1017 }
 0x7f5   :  { %v1031_v42 = vsel %vm1029_vm1, %v1018_v41, %v1020_v40 }
 0x7f6   :  { %2907 = vmatprep.subr.msk.mxu1 %vm559_vm11, %v1031_v42 }
 0x7f8   :  { %v1016_v44 = vpop.permute.xlu1 %1015 }
 0x7f9   :  { %v1030_v46 = vsel %vm1029_vm1, %v1016_v44, %v1018_v41  ;;  %v2946_v44 = vld [vmem:[%s3679_s1 + $0x30] sm:$0xff] }
 0x7fa   :  { %2908 = vmatpush1.msk.msra.mxu1 %vm559_vm11, %v1030_v46 }
 0x7fb   :  { %2909 = vmatmul.mubr.msk.f32.vlgmr.msra.gmra.mrb[0].mxu1 %vm555_vm14, %v3429_v45 }
 0x7fc   :  { %v1028_v48 = vpop.permute.xlu1 %1027  ;;  %1257 = vmatprep.mubr.f32.mxu1 %v3194_v2 }
 0x7fd   :  { %v1035_v50 = vsel %vm1029_vm1, %v1026_v43, %v1028_v48 }
 0x7fe   :  { %2913 = vmatprep.subr.msk.mxu1 %vm559_vm11, %v1035_v50 }
 0x7ff   :  { %2914 = vmatpush1.msk.msra.mxu1 %vm559_vm11, %v1034_v49 }
 0x800   :  { %v1022_v51 = vpop.permute.xlu1 %1021  ;;  %2915 = vmatmul.mubr.msk.f32.vlgmr.msra.gmra.mrb[2].mxu1 %vm555_vm14, %v3429_v45 }
 0x801   :  { %v3446_v52 = vsel %vm1029_vm1, %v1020_v40, %v1022_v51  ;;  %1372 = vmatprep.mubr.f32.mxu1 %v3194_v2  ;;  %v1033_v20 = vsel %vm1029_vm1, %v1022_v51, %v3433_v47 }
 0x804   :  { %v3449_v54 = vpop.permute.xlu1 %1276 }
 0x805   :  { %v1288_v55 = vsel %vm1286_vm3, %v1275_v53, %v3449_v54  ;;  %v1289_v30 = vsel %vm1286_vm3, %v3449_v54, %v1279_v8 }
 0x806   :  { %2917 = vmatprep.subr.msk.mxu1 %vm559_vm11, %v1288_v55 }
 0x807   :  { %2918 = vmatpush1.msk.msra.mxu1 %vm559_vm11, %v1287_v59 }
 0x808   :  { %v1283_v57 = vpop.permute.xlu1 %1282  ;;  %2919 = vmatmul.mubr.msk.f32.vlgmr.msra.gmra.mrb[0].mxu1 %vm555_vm14, %v3457_v58 }
 0x809   :  { %1514 = vmatprep.mubr.f32.mxu1 %v3194_v2  ;;  %v1292_v62 = vsel %vm1286_vm3, %v1283_v57, %v1285_v60  ;;  %v2956_v60 = vld [vmem:[%s3679_s1 + $0x38] sm:$0xff] }
 0x80a   :  { %2923 = vmatprep.subr.msk.mxu1 %vm559_vm11, %v1292_v62 }
 0x80c   :  { %v1281_v61 = vpop.permute.xlu1 %1280 }
 0x80d   :  { %v1291_v63 = vsel %vm1286_vm3, %v1281_v61, %v1283_v57 }
 0x80e   :  { %2924 = vmatpush1.msk.msra.mxu1 %vm559_vm11, %v1291_v63 }
 0x80f   :  { %2925 = vmatmul.mubr.msk.f32.vlgmr.msra.gmra.mrb[2].mxu1 %vm555_vm14, %v3457_v58 }
 0x810   :  { %v1532_v9 = vpop.permute.xlu1 %1531  ;;  %1629 = vmatprep.mubr.f32.mxu1 %v3194_v2 }
 0x811   :  { %v1545_v13 = vsel %vm1543_vm4, %v1532_v9, %v3486_v11 }
 0x812   :  { %2927 = vmatprep.subr.msk.mxu1 %vm559_vm11, %v1545_v13 }
 0x814   :  { %v1530_v12 = vpop.permute.xlu1 %1529 }
 0x815   :  { %v1544_v14 = vsel %vm1543_vm4, %v1530_v12, %v1532_v9  ;;  %v2966_v12 = vld [vmem:[%s3679_s1 + $0x40] sm:$0xff] }
 0x816   :  { %2928 = vmatpush1.msk.msra.mxu1 %vm559_vm11, %v1544_v14 }
 0x817   :  { %2929 = vmatmul.mubr.msk.f32.vlgmr.msra.gmra.mrb[0].mxu1 %vm555_vm14, %v3498_v15 }
 0x818   :  { %v1542_v18 = vpop.permute.xlu1 %1541  ;;  %1771 = vmatprep.mubr.f32.mxu1 %v3194_v2 }
 0x819   :  { %v1549_v19 = vsel %vm1543_vm4, %v1540_v16, %v1542_v18 }
 0x81a   :  { %2933 = vmatprep.subr.msk.mxu1 %vm559_vm11, %v1549_v19 }
 0x81e   :  { %s3078_s5 = spop %3077 }
 0x81f   :  { %v418_v21 = vstv %s3078_s5 }
 0x820   :  { %3118 = vrsqrt.f32 %v418_v21  ;;  %vm421_vm12 = vcmp.eq.f32.partialorder %v418_v21, inf  ;;  %v424_v24 = vand.u32 2147483648, %v418_v21  ;;  %vm423_vm13 = vcmp.eq.f32.partialorder %v418_v21, 0.0 }
 0x82a   :  { %v3119_v22 = vpop.eup %3118 }
 0x82b   :  { %v420_v23 = vmul.f32 %v3119_v22, %v418_v21  ;;  %v1536_v22 = vpop.permute.xlu1 %1535 }
 0x82c   :  { %v1546_v38 = vsel %vm1543_vm4, %v3486_v11, %v1536_v22 }
 0x82d   :  { %v422_v25 = vsel %vm421_vm12, %v418_v21, %v420_v23  ;;  %v1538_v21 = vpop.permute.xlu0 %1537 }
 0x82e   :  { %v425_v27 = vsel %vm423_vm13, %v424_v24, %v422_v25  ;;  %v1548_v23 = vsel %vm1543_vm4, %v1538_v21, %v1540_v16  ;;  %v1547_v31 = vsel %vm1543_vm4, %v1536_v22, %v1538_v21  ;;  %v3204_v22 = vmov 0  }
 0x82f   :  { %3079 = vpush %v425_v27  ;;  %2934 = vmatpush1.msk.msra.mxu1 %vm559_vm11, %v1548_v23  ;;  %v1791_v25 = vpop.permute.xlu1 %1790  ;;  %3101 = vset.pattern.permute.xlu1 %v3204_v22 }
 0x830   :  { %2935 = vmatmul.mubr.msk.f32.vlgmr.msra.gmra.mrb[2].mxu1 %vm555_vm14, %v3498_v15  ;;  %3102 = vset.pattern.permute.xlu0 %v3204_v22 }
 0x831   :  { %v1789_v24 = vpop.permute.xlu0 %1788  ;;  %1886 = vmatprep.mubr.f32.mxu1 %v3194_v2 }
 0x833   :  { %v1797_v28 = vpop.permute.xlu1 %1796 }
 0x837   :  { %v1795_v33 = vpop.permute.xlu1 %1794 }
 0x860   :  { %s3080_s10 = spop %3079 }
 0x861   :  { %s427_s11 = sadd.f32 1e-12, %s3080_s10 }
 0x863   :  { %v428_v29 = vstv %s427_s11 }
 0x864   :  { %3120 = vrcp.f32 %v428_v29  ;;  %v3538_v29 = vld [vmem:[%s3679_s1 + $0x28] sm:$0xff] }
 0x86e   :  { %v3121_v37 = vpop.eup %3120 }
 0x86f   :  { %3081 = vpush %v3121_v37  ;;  %v2046_v37 = vpop.permute.xlu1 %2045 }
 0x873   :  { %v2044_v41 = vpop.permute.xlu1 %2043 }
 0x874   :  { %v2058_v43 = vsel %vm2057_vm5, %v2044_v41, %v2046_v37 }
 0x877   :  { %v2056_v46 = vpop.permute.xlu1 %2055 }
 0x87b   :  { %v2050_v50 = vpop.permute.xlu1 %2049 }
 0x87f   :  { %v2305_v54 = vpop.permute.xlu1 %2304 }
 0x8a0   :  { %s3082_s17 = spop %3081 }
 0x8a1   :  { %v431_v1 = vstv %s3082_s17 }
 0x8a2   :  { %v432_v5 = vmul.f32 %v431_v1, %v3296_v4  ;;  %v2887_v4 = vld [vmem:[%s3679_s1 + $0x8] sm:$0xff] }
 0x8a4   :  { %2837 = vst.msk [vmem:[#allocation4] sm:$0x1] %vm209_vm6, %v432_v5  ;;  %3009 = vmatmul.mubr.msk.f32.vlgmr.msra.gmra.mrb[8].mxu0 %vm30_vm0, %v432_v5  ;;  %vm1800_vm0 = vcmask 883712   ;;  %vm2314_vm6 = vcmask 744448  }
 0x8a5   :  { %2889 = vmatpush1.msk.msra.mxu0 %vm559_vm11, %v549_v6  ;;  %636 = vmatprep.mubr.f32.mxu0 %v3194_v2  ;;  %v1802_v27 = vsel %vm1800_vm0, %v1789_v24, %v1791_v25 }
 0x8a6   :  { %2891 = vmatprep.subr.msk.mxu0 %vm559_vm11, %v552_v7  ;;  %2937 = vmatprep.subr.msk.mxu1 %vm559_vm11, %v1802_v27 }
 0x8a8   :  { %2890 = vmatmul.mubr.msk.f32.vlgmr.msra.gmra.mrb[10].mxu0 %vm555_vm14, %v2887_v4 }
 0x8a9   :  { %2892 = vmatpush1.msk.msra.mxu0 %vm559_vm11, %v3408_v35  ;;  %707 = vmatprep.mubr.f32.mxu0 %v3194_v2  ;;  %v1805_v35 = vsel %vm1800_vm0, %v1795_v33, %v1797_v28 }
 0x8aa   :  { %2894 = vmatprep.subr.msk.mxu0 %vm559_vm11, %v554_v10 }
 0x8ac   :  { %2893 = vmatmul.mubr.msk.f32.vlgmr.msra.gmra.mrb[12].mxu0 %vm555_vm14, %v2887_v4 }
 0x8ad   :  { %2895 = vmatpush1.msk.msra.mxu0 %vm559_vm11, %v3418_v39  ;;  %778 = vmatprep.mubr.f32.mxu0 %v3194_v2 }
 0x8ae   :  { %2900 = vmatprep.subr.msk.mxu0 %vm559_vm11, %v3320_v17  ;;  %v1290_v17 = vsel %vm1286_vm3, %v1279_v8, %v1281_v61 }
 0x8b0   :  { %2896 = vmatmul.mubr.msk.f32.vlgmr.msra.gmra.mrb[14].mxu0 %vm555_vm14, %v2887_v4 }
 0x8b1   :  { %2901 = vmatpush1.msk.msra.mxu0 %vm559_vm11, %v3304_v0  ;;  %935 = vmatprep.mubr.f32.mxu0 %v3194_v2  ;;  %v1787_v0 = vpop.permute.xlu0 %1786 }
 0x8b2   :  { %2910 = vmatprep.subr.msk.mxu0 %vm559_vm11, %v1033_v20 }
 0x8b4   :  { %2902 = vmatmul.mubr.msk.f32.vlgmr.msra.gmra.mrb[12].mxu0 %vm555_vm14, %v3362_v26  ;;  %v1801_v26 = vsel %vm1800_vm0, %v1787_v0, %v1789_v24 }
 0x8b5   :  { %2911 = vmatpush1.msk.msra.mxu0 %vm559_vm11, %v3446_v52  ;;  %1186 = vmatprep.mubr.f32.mxu0 %v3194_v2  ;;  %v1799_v32 = vpop.permute.xlu0 %1798 }
 0x8b6   :  { %2920 = vmatprep.subr.msk.mxu0 %vm559_vm11, %v1290_v17  ;;  %2938 = vmatpush1.msk.msra.mxu1 %vm559_vm11, %v1801_v26  ;;  %v1806_v34 = vsel %vm1800_vm0, %v1797_v28, %v1799_v32 }
 0x8b7   :  { %2939 = vmatmul.mubr.msk.f32.vlgmr.msra.gmra.mrb[0].mxu1 %vm555_vm14, %v3538_v29  ;;  %2943 = vmatprep.subr.msk.mxu1 %vm559_vm11, %v1806_v34 }
 0x8b8   :  { %2028 = vmatprep.mubr.f32.mxu1 %v3194_v2  ;;  %2944 = vmatpush1.msk.msra.mxu1 %vm559_vm11, %v1805_v35 }
 0x8b9   :  { %v1793_v36 = vpop.permute.xlu0 %1792 }
 0x8ba   :  { %v1804_v39 = vsel %vm1800_vm0, %v1793_v36, %v1795_v33  ;;  %v1803_v48 = vsel %vm1800_vm0, %v1791_v25, %v1793_v36 }
 0x8bb   :  { %2945 = vmatmul.mubr.msk.f32.vlgmr.msra.gmra.mrb[2].mxu1 %vm555_vm14, %v3538_v29 }
 0x8bc   :  { %2912 = vmatmul.mubr.msk.f32.vlgmr.msra.gmra.mrb[12].mxu0 %vm555_vm14, %v3429_v45  ;;  %2143 = vmatprep.mubr.f32.mxu1 %v3194_v2 }
 0x8bd   :  { %2921 = vmatpush1.msk.msra.mxu0 %vm559_vm11, %v1289_v30  ;;  %1443 = vmatprep.mubr.f32.mxu0 %v3194_v2  ;;  %v2048_v40 = vpop.permute.xlu0 %2047 }
 0x8be   :  { %2930 = vmatprep.subr.msk.mxu0 %vm559_vm11, %v1547_v31  ;;  %v2059_v42 = vsel %vm2057_vm5, %v2046_v37, %v2048_v40  ;;  %v2060_v56 = vsel %vm2057_vm5, %v2048_v40, %v2050_v50 }
 0x8bf   :  { %2947 = vmatprep.subr.msk.mxu1 %vm559_vm11, %v2059_v42 }
 0x8c0   :  { %2948 = vmatpush1.msk.msra.mxu1 %vm559_vm11, %v2058_v43 }
 0x8c1   :  { %v2054_v45 = vpop.permute.xlu0 %2053  ;;  %2949 = vmatmul.mubr.msk.f32.vlgmr.msra.gmra.mrb[0].mxu1 %vm555_vm14, %v2946_v44 }
 0x8c2   :  { %v2063_v47 = vsel %vm2057_vm5, %v2054_v45, %v2056_v46  ;;  %2285 = vmatprep.mubr.f32.mxu1 %v3194_v2 }
 0x8c3   :  { %2953 = vmatprep.subr.msk.mxu1 %vm559_vm11, %v2063_v47 }
 0x8c4   :  { %2922 = vmatmul.mubr.msk.f32.vlgmr.msra.gmra.mrb[12].mxu0 %vm555_vm14, %v3457_v58  ;;  %v2311_v58 = vpop.permute.xlu1 %2310 }
 0x8c5   :  { %2931 = vmatpush1.msk.msra.mxu0 %vm559_vm11, %v1546_v38  ;;  %1700 = vmatprep.mubr.f32.mxu0 %v3194_v2  ;;  %v2052_v49 = vpop.permute.xlu0 %2051 }
 0x8c6   :  { %2940 = vmatprep.subr.msk.mxu0 %vm559_vm11, %v1804_v39  ;;  %v2062_v51 = vsel %vm2057_vm5, %v2052_v49, %v2054_v45  ;;  %v2061_v52 = vsel %vm2057_vm5, %v2050_v50, %v2052_v49 }
 0x8c7   :  { %2954 = vmatpush1.msk.msra.mxu1 %vm559_vm11, %v2062_v51 }
 0x8c8   :  { %2955 = vmatmul.mubr.msk.f32.vlgmr.msra.gmra.mrb[2].mxu1 %vm555_vm14, %v2946_v44  ;;  %v2309_v62 = vpop.permute.xlu1 %2308 }
 0x8c9   :  { %v2303_v53 = vpop.permute.xlu0 %2302  ;;  %2400 = vmatprep.mubr.f32.mxu1 %v3194_v2  ;;  %v2319_v1 = vsel %vm2314_vm6, %v2309_v62, %v2311_v58 }
 0x8ca   :  { %v2316_v55 = vsel %vm2314_vm6, %v2303_v53, %v2305_v54 }
 0x8cb   :  { %2957 = vmatprep.subr.msk.mxu1 %vm559_vm11, %v2316_v55 }
 0x8cc   :  { %2932 = vmatmul.mubr.msk.f32.vlgmr.msra.gmra.mrb[12].mxu0 %vm555_vm14, %v3498_v15  ;;  %v2560_v6 = vpop.permute.xlu1 %2559 }
 0x8cd   :  { %2941 = vmatpush1.msk.msra.mxu0 %vm559_vm11, %v1803_v48  ;;  %1957 = vmatprep.mubr.f32.mxu0 %v3194_v2  ;;  %v2301_v57 = vpop.permute.xlu0 %2300 }
 0x8ce   :  { %2950 = vmatprep.subr.msk.mxu0 %vm559_vm11, %v2061_v52  ;;  %v2315_v59 = vsel %vm2314_vm6, %v2301_v57, %v2303_v53 }
 0x8cf   :  { %2958 = vmatpush1.msk.msra.mxu1 %vm559_vm11, %v2315_v59 }
 0x8d0   :  { %2959 = vmatmul.mubr.msk.f32.vlgmr.msra.gmra.mrb[0].mxu1 %vm555_vm14, %v2956_v60  ;;  %v2558_v4 = vpop.permute.xlu1 %2557 }
 0x8d1   :  { %v2313_v61 = vpop.permute.xlu0 %2312  ;;  %2542 = vmatprep.mubr.f32.mxu1 %v3194_v2  ;;  %v2572_v11 = vsel %vm2571_vm7, %v2558_v4, %v2560_v6 }
 0x8d2   :  { %v2320_v63 = vsel %vm2314_vm6, %v2311_v58, %v2313_v61 }
 0x8d3   :  { %2963 = vmatprep.subr.msk.mxu1 %vm559_vm11, %v2320_v63 }
 0x8d4   :  { %2942 = vmatmul.mubr.msk.f32.vlgmr.msra.gmra.mrb[12].mxu0 %vm555_vm14, %v3538_v29  ;;  %2964 = vmatpush1.msk.msra.mxu1 %vm559_vm11, %v2319_v1  ;;  %v2570_v14 = vpop.permute.xlu1 %2569 }
 0x8d5   :  { %2951 = vmatpush1.msk.msra.mxu0 %vm559_vm11, %v2060_v56  ;;  %2214 = vmatprep.mubr.f32.mxu0 %v3194_v2  ;;  %v2307_v5 = vpop.permute.xlu0 %2306 }
 0x8d6   :  { %2965 = vmatmul.mubr.msk.f32.vlgmr.msra.gmra.mrb[2].mxu1 %vm555_vm14, %v2956_v60  ;;  %v2317_v7 = vsel %vm2314_vm6, %v2305_v54, %v2307_v5  ;;  %v2318_v8 = vsel %vm2314_vm6, %v2307_v5, %v2309_v62 }
 0x8d7   :  { %2657 = vmatprep.mubr.f32.mxu1 %v3194_v2  ;;  %2960 = vmatprep.subr.msk.mxu0 %vm559_vm11, %v2318_v8 }
 0x8d8   :  { %v2564_v18 = vpop.permute.xlu1 %2563 }
 0x8d9   :  { %v2562_v9 = vpop.permute.xlu0 %2561 }
 0x8da   :  { %v2573_v10 = vsel %vm2571_vm7, %v2560_v6, %v2562_v9  ;;  %v2574_v20 = vsel %vm2571_vm7, %v2562_v9, %v2564_v18 }
 0x8db   :  { %2967 = vmatprep.subr.msk.mxu1 %vm559_vm11, %v2573_v10 }
 0x8dc   :  { %2952 = vmatmul.mubr.msk.f32.vlgmr.msra.gmra.mrb[12].mxu0 %vm555_vm14, %v2946_v44  ;;  %2968 = vmatpush1.msk.msra.mxu1 %vm559_vm11, %v2572_v11 }
 0x8dd   :  { %2471 = vmatprep.mubr.f32.mxu0 %v3194_v2  ;;  %2961 = vmatpush1.msk.msra.mxu0 %vm559_vm11, %v2317_v7  ;;  %v2568_v13 = vpop.permute.xlu0 %2567 }
 0x8de   :  { %2969 = vmatmul.mubr.msk.f32.vlgmr.msra.gmra.mrb[0].mxu1 %vm555_vm14, %v2966_v12  ;;  %v2577_v15 = vsel %vm2571_vm7, %v2568_v13, %v2570_v14 }
 0x8df   :  { %2799 = vmatprep.mubr.f32.mxu1 %v3194_v2  ;;  %2973 = vmatprep.subr.msk.mxu1 %vm559_vm11, %v2577_v15 }
 0x8e1   :  { %v2566_v16 = vpop.permute.xlu0 %2565 }
 0x8e2   :  { %v2576_v19 = vsel %vm2571_vm7, %v2566_v16, %v2568_v13  ;;  %v2575_v21 = vsel %vm2571_vm7, %v2564_v18, %v2566_v16 }
 0x8e3   :  { %2970 = vmatprep.subr.msk.mxu0 %vm559_vm11, %v2575_v21  ;;  %2974 = vmatpush1.msk.msra.mxu1 %vm559_vm11, %v2576_v19 }
 0x8e4   :  { %2962 = vmatmul.mubr.msk.f32.vlgmr.msra.gmra.mrb[12].mxu0 %vm555_vm14, %v2956_v60  ;;  %2975 = vmatmul.mubr.msk.f32.vlgmr.msra.gmra.mrb[2].mxu1 %vm555_vm14, %v2966_v12 }
 0x8e5   :  { %2728 = vmatprep.mubr.f32.mxu0 %v3194_v2  ;;  %2971 = vmatpush1.msk.msra.mxu0 %vm559_vm11, %v2574_v20  ;;  %v2819_v2 = vld [vmem:[%s3682_s4] sm:$0xff]  ;;  %s3205_s4 = smov [#allocation4]  }
 0x8e6   :  { %2822 = vperm.xlu1 %3101, %v2819_v2   ;;  %s2855_s29 = sshll.u32 %s3205_s4, 4  ;;  %s2856_s29 = int_to_ptr.vmem [resolvable:$true] %s2855_s29 }
 0x8e7   :  { %s3124_s0 = scalar_lea.vmem %s2856_s29, 16  ;;  %s3128_s2 = scalar_lea.vmem %s2856_s29, 32 }
 0x8e8   :  { %p3125_p0 = scmp.ne.s32.totalorder %s2856_s29, %s3124_s0  ;;  %p3129_p1 = scmp.lt.s32.totalorder %s2856_s29, %s2856_s29 }
 0x8e9   :  { %p3130_p2 = scmp.lt.s32.totalorder %s3128_s2, %s3124_s0 }
 0x8eb   :  { %p3131_p3 = por %p3130_p2, %p3129_p1 }
 0x8ec   :  { %2972 = vmatmul.mubr.msk.f32.vlgmr.msra.gmra.mrb[12].mxu0 %vm555_vm14, %v2966_v12 }
 0x8ed   :  { %p3132_p4 = pnand %p3131_p3, %p3125_p0 }
 0x977   :  { %v502_v23 = vpop.f32.mrb[8].mxu0 }
 0x978   :  { %v506_v17 = vmul.f32 %v502_v23, %v3287_v3  ;;  %v3010_v24 = vpop.f32.mrb[9].mxu0 }
 0x97a   :  { %v507_v25 = vsel %vm105_vm2, %v506_v17, 0.0 }
 0x97b   :  { %508 = vadd.xlane.f32.xlu0 %v507_v25  ;;  %v638_v27 = vpop.f32.mrb[10].mxu0 }
 0x97c   :  { %v640_v0 = vpop.f32.mrb[11].mxu0 }
 0x983   :  { %v780_v28 = vpop.f32.mrb[14].mxu0 }
 0x984   :  { %v782_v29 = vpop.f32.mrb[15].mxu0 }
 0x9b1   :  { %v2659_v26 = vpop.f32.mrb[0].mxu1 }
 0x9b2   :  { %v3011_v30 = vadd.f32 %v2659_v26, %v638_v27  ;;  %v2661_v31 = vpop.f32.mrb[1].mxu1 }
 0x9b3   :  { %v3012_v32 = vadd.f32 %v2661_v31, %v640_v0 }
 0x9b7   :  { %v2801_v35 = vpop.f32.mrb[2].mxu1 }
 0x9b8   :  { %v3013_v36 = vadd.f32 %v2801_v35, %v780_v28  ;;  %v2803_v37 = vpop.f32.mrb[3].mxu1 }
 0x9b9   :  { %v3014_v38 = vadd.f32 %v2803_v37, %v782_v29 }
 0x9bf   :  { %v2730_v33 = vpop.f32.mrb[12].mxu0 }
 0x9c0   :  { %v2732_v34 = vpop.f32.mrb[13].mxu0 }
 0xa08   :  { %v509_v39 = vpop.xlane.xlu0 %508 }
 0xa09   :  { %v510_v3 = vrot.slane %v509_v39, 4 }
 0xa0b   :  { %v511_v40 = vadd.f32 %v510_v3, %v509_v39 }
 0xa0c   :  { %3135 = shalt.err (!%p3132_p4)
}
 0xa0d   :  { %s3136_s10 = scalar_lea.hbm %s3685_s7, 16 }
 0xa0e   :  { %p3137_p5 = scmp.ne.s32.totalorder %s3685_s7, %s3136_s10  ;;  %p3140_p6 = scmp.lt.u32.totalorder %s3136_s10, %s3685_s7 }
 0xa10   :  { %p3142_p7 = pnand %p3140_p6, %p3137_p5 }
 0xa12   :  { %3145 = shalt.err (!%p3142_p7)
}
 0xa13   :  { %2858 = dma.vmem_to_hbm [thread:$0]  %s2856_s29, 16, %s3685_s7, [#allocation5]   ;;  %v512_v41 = vrot.slane %v511_v40, 2 }
 0xa14   :  { %s3206_s17 = smov [#allocation6]  }
 0xa15   :  { %s2865_s18 = sshll.u32 %s3206_s17, 4  ;;  %v513_v42 = vadd.f32 %v512_v41, %v511_v40  ;;  %s2866_s18 = int_to_ptr.vmem [resolvable:$true] %s2865_s18 }
 0xa16   :  { %s3146_s19 = scalar_lea.vmem %s2866_s18, 16  ;;  %s3150_s20 = scalar_lea.vmem %s2866_s18, 32 }
 0xa17   :  { %p3147_p8 = scmp.ne.s32.totalorder %s2866_s18, %s3146_s19  ;;  %p3151_p9 = scmp.lt.s32.totalorder %s2866_s18, %s2866_s18 }
 0xa18   :  { %p3152_p10 = scmp.lt.s32.totalorder %s3150_s20, %s3146_s19 }
 0xa1a   :  { %p3153_p11 = por %p3152_p10, %p3151_p9 }
 0xa1c   :  { %p3154_p12 = pnand %p3153_p11, %p3147_p8 }
 0xa1e   :  { %3157 = shalt.err (!%p3154_p12)
}
 0xa1f   :  { %s3158_s23 = scalar_lea.hbm %s3686_s8, 16 }
 0xa20   :  { %p3159_p13 = scmp.ne.s32.totalorder %s3686_s8, %s3158_s23  ;;  %p3162_p0 = scmp.lt.u32.totalorder %s3158_s23, %s3686_s8 }
 0xa22   :  { %p3164_p1 = pnand %p3162_p0, %p3159_p13 }
 0xa24   :  { %3167 = shalt.err (!%p3164_p1)
}
 0xa25   :  { %2868 = dma.vmem_to_hbm [thread:$0]  %s2866_s18, 16, %s3686_s8, [#allocation5]   ;;  %v514_v43 = vrot.slane %v513_v42, 1  ;;  %v2823_v48 = vpop.permute.xlu1 %2822 }
 0xa26   :  { %s3207_s3 = smov [#allocation2]  }
 0xa27   :  { %v515_v44 = vadd.f32 %v514_v43, %v513_v42  ;;  %s2845_s4 = sshll.u32 %s3207_s3, 4  ;;  %s2846_s4 = int_to_ptr.vmem [resolvable:$true] %s2845_s4 }
 0xa28   :  { %s3168_s8 = scalar_lea.vmem %s2846_s4, 768  ;;  %p3173_p3 = scmp.lt.s32.totalorder %s2846_s4, %s2846_s4 }
 0xa29   :  { %3083 = vpush %v515_v44  ;;  %p3169_p2 = scmp.ne.s32.totalorder %s2846_s4, %s3168_s8  ;;  %p3174_p4 = scmp.lt.s32.totalorder %s3168_s8, %s3168_s8 }
 0xa2b   :  { %p3175_p5 = por %p3174_p4, %p3173_p3 }
 0xa2d   :  { %p3176_p6 = pnand %p3175_p5, %p3169_p2 }
 0xa5a   :  { %s3084_s28 = spop %3083 }
 0xa5b   :  { %v517_v45 = vstv %s3084_s28 }
 0xa5c   :  { %3122 = vrcp.f32 %v517_v45 }
 0xa66   :  { %v3123_v46 = vpop.eup %3122 }
 0xa67   :  { %3085 = vpush %v3123_v46 }
 0xa98   :  { %s3086_s1 = spop %3085 }
 0xa99   :  { %v2812_v47 = vstv %s3086_s1 }
 0xa9a   :  { %v2813_v49 = vmul.f32 %v3011_v30, %v2812_v47  ;;  %v2814_v50 = vmul.f32 %v3012_v32, %v2812_v47  ;;  %v2815_v51 = vmul.f32 %v2812_v47, %v2730_v33  ;;  %v2816_v52 = vmul.f32 %v2812_v47, %v2732_v34 }
 0xa9b   :  { %v2817_v53 = vmul.f32 %v3013_v36, %v2812_v47  ;;  %v2818_v54 = vmul.f32 %v3014_v38, %v2812_v47 }
 0xa9c   :  { %v2825_v55 = vadd.f32 %v2823_v48, %v2813_v49  ;;  %v2826_v56 = vadd.f32 %v2823_v48, %v2814_v50  ;;  %v2827_v57 = vadd.f32 %v2823_v48, %v2815_v51  ;;  %v2828_v58 = vadd.f32 %v2823_v48, %v2816_v52 }
 0xa9d   :  { %v2829_v59 = vadd.f32 %v2823_v48, %v2817_v53  ;;  %v2830_v60 = vadd.f32 %v2823_v48, %v2818_v54 }
 0xa9e   :  { %2831 = vst [vmem:[#allocation2] sm:$0xff] %v2825_v55  ;;  %2832 = vst [vmem:[#allocation2 + $0x8] sm:$0xff] %v2826_v56 }
 0xa9f   :  { %2833 = vst [vmem:[#allocation2 + $0x10] sm:$0xff] %v2827_v57  ;;  %2834 = vst [vmem:[#allocation2 + $0x18] sm:$0xff] %v2828_v58 }
 0xaa0   :  { %2835 = vst [vmem:[#allocation2 + $0x20] sm:$0xff] %v2829_v59  ;;  %2836 = vst [vmem:[#allocation2 + $0x28] sm:$0xff] %v2830_v60 }
 0xaa1   :  { %3179 = shalt.err (!%p3176_p6)
}
 0xaa2   :  { %s3180_s2 = scalar_lea.hbm %s3684_s6, 768 }
 0xaa3   :  { %p3181_p7 = scmp.ne.s32.totalorder %s3684_s6, %s3180_s2  ;;  %p3184_p8 = scmp.lt.u32.totalorder %s3180_s2, %s3684_s6 }
 0xaa5   :  { %p3186_p9 = pnand %p3184_p8, %p3181_p7 }
 0xaa7   :  { %3189 = shalt.err (!%p3186_p9)
}
 0xaa8   :  { %2848 = dma.vmem_to_hbm [thread:$0]  %s2846_s4, 768, %s3684_s6, [#allocation3]  }
 0xaa9   :  { %3190 = dma.done.wait [#allocation3], 768  }
 0xaaa   :  { %3191 = vsyncadd [#allocation3], 4294966528 }
 0xaab   :  { %3192 = dma.done.wait [#allocation5], 32  }
 0xaac   :  { %3193 = vsyncadd [#allocation5], 4294967264 }
 0xaad   :  { %2878 = vsyncpa [#allocation3], 1 }
 0xaae   :  { %2879 = vsyncpa [#allocation5], 1 }

</bundles_post_ra>
